<compile_context>
chip_gen: v7x
topology: tpu7x:2x2x1
jax: 0.10.0
libtpu: 0.0.40
codegen_flags: <defaults>
</compile_context>

<pallas_src>
import functools

import jax
import jax.numpy as jnp
from jax.experimental import pallas as pl
from jax.experimental.pallas import tpu as pltpu


def _round_up(n, m):
    return ((n + m - 1) // m) * m


def _ceil_div(a, b):
    return -(-a // b)


@functools.lru_cache(maxsize=1)
def _default_relu_in_bf16():
    """bf16 VPU exists on v6e/v7x; v5-class chips keep the relu in f32."""
    try:
        kind = jax.devices()[0].device_kind.lower()
    except Exception:
        return True
    return "v5" not in kind


def _choose_tb(batch, tb=None):
    """Pick the batch tile.

    - Explicit tb is honored (rounded to a multiple of 8 if it tiles the batch).
    - B < 256: one full-batch tile (full-dim block is always legal, no padding).
    - B >= 256: at least 2 tiles (feeds both v7x TensorCores), tiles <= 1024 rows
      to amortize the ~0.35 us per-grid-step overhead.
    """
    if tb is not None:
        tb = int(tb)
        if tb >= batch:
            return batch
        return max(8, _round_up(tb, 8))
    if batch < 256:
        return batch
    n_tiles = max(2, _ceil_div(batch, 1024))
    return min(1024, _round_up(_ceil_div(batch, n_tiles), 8))


def _make_mlp_kernel(num_layers, relu_in_bf16, compute_dtype=jnp.bfloat16):
    """Fused MLP kernel: x -> L1 -> relu -> ... -> relu -> L_n.

    refs = (w1, b1, ..., wL, bL, out_ref). Weights are bf16 (MXU fast path),
    accumulation and bias add are f32; biases stay f32.
    """

    def kernel(x_ref, *refs):
        out_ref = refs[-1]
        h = x_ref[...].astype(compute_dtype)                 # cast in-kernel
        for i in range(num_layers):
            w = refs[2 * i][...]                             # bf16 [K_p, N_p]
            b = refs[2 * i + 1][...]                         # f32  [1, N_p]
            acc = jnp.dot(h, w, preferred_element_type=jnp.float32) + b
            if i < num_layers - 1:
                if relu_in_bf16:
                    # round-then-relu == relu-then-round for bf16.
                    h = jnp.maximum(acc.astype(compute_dtype), 0)
                else:
                    h = jnp.maximum(acc, 0.0).astype(compute_dtype)
            else:
                h = acc
        out_ref[...] = h.astype(out_ref.dtype)

    return kernel


def _mlp_forward(x, params, *, tb, relu_in_bf16):
    """Jitted fused forward over pre-padded, pre-cast parameters.

    x: [B, in_dim] (any float dtype).  params: flat tuple (w1, b1, ..., wL, bL)
    with hidden dims already zero-padded to multiples of 128 and cast to bf16
    (weights) / f32 (biases).  Returns [B, out_dim] in x.dtype.
    """
    num_layers = len(params) // 2
    batch, in_dim = x.shape
    out_dim = params[-2].shape[1]
    out_dtype = x.dtype

    b_pad = _round_up(batch, tb)
    if b_pad != batch:
        x = jnp.pad(x, ((0, b_pad - batch), (0, 0)))   # rows-only, tiny
    grid = (b_pad // tb,)

    # x/out are batch-tiled; weight/bias blocks use a constant index_map so they
    # are DMA'd into VMEM once and stay resident across every batch tile.
    # TODO(synk): mark the parameter specs pipeline_mode=pl.Buffered(1) (pure
    # VMEM saving for constant-index operands) once confirmed supported by the
    # pallas_call pipeline on the deployed jax version; irrelevant at H<=256.
    in_specs = [pl.BlockSpec((tb, in_dim), lambda i: (i, 0))]
    for p in params:
        in_specs.append(pl.BlockSpec(p.shape, lambda i: (0, 0)))
    out_specs = pl.BlockSpec((tb, out_dim), lambda i: (i, 0))

    widths_p = [in_dim] + [params[2 * i].shape[1] for i in range(num_layers)]
    flops = 2 * b_pad * sum(widths_p[i] * widths_p[i + 1]
                            for i in range(num_layers))
    param_bytes = sum(int(p.size) * p.dtype.itemsize for p in params)
    bytes_accessed = (int(x.size) * x.dtype.itemsize + param_bytes
                      + b_pad * out_dim * jnp.dtype(out_dtype).itemsize)

    # VMEM budget: resident params (double-buffered by the default pipeline) +
    # double-buffered activation tiles + f32 accumulator headroom.
    vmem_est = (2 * (param_bytes
                     + tb * in_dim * x.dtype.itemsize
                     + tb * out_dim * jnp.dtype(out_dtype).itemsize)
                + 4 * tb * max(widths_p) * 4)
    cp_kwargs = dict(dimension_semantics=("parallel",))
    if vmem_est > 24 * (1 << 20):
        # TODO(synk): if vmem_est nears v7x's 64 MiB physical VMEM, stream the
        # weights over an extra grid axis instead of keeping them resident.
        cp_kwargs["vmem_limit_bytes"] = int(min(vmem_est + (8 << 20), 120 << 20))

    out = pl.pallas_call(
        _make_mlp_kernel(num_layers, relu_in_bf16),
        out_shape=jax.ShapeDtypeStruct((b_pad, out_dim), out_dtype),
        grid=grid,
        in_specs=in_specs,
        out_specs=out_specs,
        compiler_params=pltpu.CompilerParams(**cp_kwargs),
        cost_estimate=pl.CostEstimate(flops=flops, transcendentals=0,
                                      bytes_accessed=bytes_accessed),
    )(x, *params)

    return out if b_pad == batch else out[:batch]


_mlp_forward_jit = jax.jit(_mlp_forward, static_argnames=("tb", "relu_in_bf16"))


class ProgressiveNetwork:
    """JAX/Pallas port of the PyTorch ProgressiveNetwork (forward pass only)."""

    def __init__(self, input_dim, output_dim, hidden_dims=(256, 256),
                 stage=1, max_stages=3, key=None, dtype=jnp.float32,
                 compute_dtype=jnp.bfloat16):
        self.input_dim = input_dim
        self.output_dim = output_dim
        self.stage = stage
        self.max_stages = max_stages
        self.dtype = dtype
        self.compute_dtype = compute_dtype
        if key is None:
            key = jax.random.PRNGKey(0)

        # Layer shapes per stage, mirroring the PyTorch __init__.
        stage_shapes = [
            [(input_dim, hidden_dims[0]), (hidden_dims[0], output_dim)],
        ]
        if max_stages >= 2:
            stage_shapes.append([
                (input_dim, hidden_dims[0]),
                (hidden_dims[0], hidden_dims[0]),
                (hidden_dims[0], output_dim),
            ])
        if max_stages >= 3:
            stage_shapes.append([
                (input_dim, hidden_dims[0]),
                (hidden_dims[0], hidden_dims[1]),
                (hidden_dims[1], hidden_dims[0]),
                (hidden_dims[0], output_dim),
            ])

        # Deterministic init mimicking torch.nn.Linear defaults:
        # U(-1/sqrt(fan_in), 1/sqrt(fan_in)) for both weights and biases.
        self.networks = []
        for shapes in stage_shapes:
            layers = []
            for (fan_in, fan_out) in shapes:
                key, kw, kb = jax.random.split(key, 3)
                bound = 1.0 / jnp.sqrt(jnp.float32(fan_in))
                w = jax.random.uniform(kw, (fan_in, fan_out), dtype,
                                       minval=-bound, maxval=bound)
                b = jax.random.uniform(kb, (fan_out,), dtype,
                                       minval=-bound, maxval=bound)
                layers.append((w, b))
            self.networks.append(layers)

        # Pre-pad / pre-cast every stage ONCE (perf review #1): hidden dims are
        # zero-padded to multiples of 128, weights cast to bf16, biases to f32.
        self._padded = [self._pad_stage(layers) for layers in self.networks]

    def _pad_stage(self, layers):
        dims = [layers[0][0].shape[0]] + [w.shape[1] for (w, _) in layers]
        dims_p = list(dims)
        for j in range(1, len(dims) - 1):            # pad hidden dims only
            dims_p[j] = _round_up(dims[j], 128)
        flat = []
        for i, (w, b) in enumerate(layers):
            wp = jnp.zeros((dims_p[i], dims_p[i + 1]), self.compute_dtype)
            wp = wp.at[:w.shape[0], :w.shape[1]].set(w.astype(self.compute_dtype))
            bp = jnp.zeros((1, dims_p[i + 1]), jnp.float32)
            bp = bp.at[0, :b.shape[0]].set(b.astype(jnp.float32))
            flat += [wp, bp]
        return tuple(flat)

    def forward(self, x, tb=None):
        params = self._padded[self.stage - 1]
        tb_sel = _choose_tb(x.shape[0], tb)
        return _mlp_forward_jit(x, params, tb=tb_sel,
                                relu_in_bf16=_default_relu_in_bf16())

    def forward_ref_f32(self, x):
        """Plain-JAX f32 reference."""
        layers = self.networks[self.stage - 1]
        h = x.astype(jnp.float32)
        for i, (w, b) in enumerate(layers):
            h = h @ w.astype(jnp.float32) + b.astype(jnp.float32)
            if i < len(layers) - 1:
                h = jnp.maximum(h, 0.0)
        return h.astype(x.dtype)

    def forward_ref_bf16(self, x):
        """Plain-JAX reference with the kernel's numerics (bf16 operands,
        f32 accumulation, f32 bias add)."""
        layers = self.networks[self.stage - 1]
        h = x.astype(jnp.bfloat16)
        for i, (w, b) in enumerate(layers):
            acc = jnp.dot(h, w.astype(jnp.bfloat16),
                          preferred_element_type=jnp.float32)
            acc = acc + b.astype(jnp.float32)
            if i < len(layers) - 1:
                h = jnp.maximum(acc, 0.0).astype(jnp.bfloat16)
            else:
                h = acc
        return h.astype(x.dtype)

    def increase_complexity(self):
        # TODO(synk): PyTorch version deep-copies state_dict and logs; only the
        # stage bump matters for the forward kernel (padded params for every
        # stage are already cached).
        if self.stage < self.max_stages:
            prev = self.networks[self.stage - 1]
            self.stage += 1
            return prev
        return None


if __name__ == "__main__":
    key = jax.random.PRNGKey(0)
    k_params, k_x, k_x2, k_x3 = jax.random.split(key, 4)

    batch = 2
    input_dim = 16
    output_dim = 8
    hidden_dims = (32, 32)

    x = jax.random.normal(k_x, (batch, input_dim), dtype=jnp.float32)

    ok = True
    # Exercise all three progressive stages (forward uses networks[stage-1]).
    for stage in (1, 2, 3):
        net = ProgressiveNetwork(input_dim, output_dim, hidden_dims,
                                 stage=stage, max_stages=3, key=k_params)
        out = jax.block_until_ready(net.forward(x))
        ref_bf16 = jax.block_until_ready(net.forward_ref_bf16(x))
        ref_f32 = jax.block_until_ready(net.forward_ref_f32(x))
        ok &= out.shape == (batch, output_dim)
        ok &= bool(jnp.allclose(out, ref_bf16, atol=2e-3, rtol=2e-3))
        ok &= bool(jnp.allclose(out, ref_f32, atol=5e-2, rtol=5e-2))

    net3 = ProgressiveNetwork(input_dim, output_dim, hidden_dims,
                              stage=3, max_stages=3, key=k_params)

    # Multi-tile grid with a batch remainder (rows-only pad, sliced off).
    x2 = jax.random.normal(k_x2, (20, input_dim), dtype=jnp.float32)
    out2 = jax.block_until_ready(net3.forward(x2, tb=8))
    ok &= out2.shape == (20, output_dim)
    ok &= bool(jnp.allclose(out2, net3.forward_ref_bf16(x2),
                            atol=2e-3, rtol=2e-3))

    # Auto tile selection: B >= 256 -> >= 2 batch tiles (both v7x TCs fed).
    x3 = jax.random.normal(k_x3, (384, input_dim), dtype=jnp.float32)
    out3 = jax.block_until_ready(net3.forward(x3))
    ok &= out3.shape == (384, output_dim)
    ok &= bool(jnp.allclose(out3, net3.forward_ref_bf16(x3),
                            atol=2e-3, rtol=2e-3))

    # Stage bump path: cached padded params for the new stage are reused.
    net_prog = ProgressiveNetwork(input_dim, output_dim, hidden_dims,
                                  stage=1, max_stages=3, key=k_params)
    net_prog.increase_complexity()
    out4 = jax.block_until_ready(net_prog.forward(x))
    ok &= bool(jnp.allclose(out4, net_prog.forward_ref_bf16(x),
                            atol=2e-3, rtol=2e-3))

    if ok:
        print("KERNEL_OK")
</pallas_src>

<mosaic_0001>
module attributes {stable_mosaic.version = 11 : i64} {
  func.func @kernel(%arg0: i32, %arg1: memref<2x16xf32, #tpu.memory_space<vmem>>, %arg2: memref<16x128xbf16, #tpu.memory_space<vmem>>, %arg3: memref<1x128xf32, #tpu.memory_space<vmem>>, %arg4: memref<128x8xbf16, #tpu.memory_space<vmem>>, %arg5: memref<1x8xf32, #tpu.memory_space<vmem>>, %arg6: memref<2x8xf32, #tpu.memory_space<vmem>>) attributes {dimension_semantics = [#tpu.dimension_semantics<parallel>], iteration_bounds = array<i64: 1>, scalar_prefetch = 0 : i64, scratch_operands = 0 : i64, tpu.core_type = #tpu.core_type<tc>, window_params = [{transform_indices = @transform_0, window_bounds = array<i64: 2, 16>}, {pipeline_mode = #tpu.pipeline_mode<synchronous>, transform_indices = @transform_1, window_bounds = array<i64: 16, 128>}, {pipeline_mode = #tpu.pipeline_mode<synchronous>, transform_indices = @transform_2, window_bounds = array<i64: 1, 128>}, {pipeline_mode = #tpu.pipeline_mode<synchronous>, transform_indices = @transform_3, window_bounds = array<i64: 128, 8>}, {pipeline_mode = #tpu.pipeline_mode<synchronous>, transform_indices = @transform_4, window_bounds = array<i64: 1, 8>}, {transform_indices = @transform_5, window_bounds = array<i64: 2, 8>}]} {
    %c0 = arith.constant 0 : index
    %c0_0 = arith.constant 0 : index
    %0 = vector.load %arg1[%c0, %c0_0] : memref<2x16xf32, #tpu.memory_space<vmem>>, vector<2x16xf32>
    %1 = arith.truncf %0 : vector<2x16xf32> to vector<2x16xbf16>
    %c0_1 = arith.constant 0 : index
    %c0_2 = arith.constant 0 : index
    %2 = vector.load %arg2[%c0_1, %c0_2] : memref<16x128xbf16, #tpu.memory_space<vmem>>, vector<16x128xbf16>
    %c0_3 = arith.constant 0 : index
    %c0_4 = arith.constant 0 : index
    %3 = vector.load %arg3[%c0_3, %c0_4] : memref<1x128xf32, #tpu.memory_space<vmem>>, vector<1x128xf32>
    %cst = arith.constant dense<0.000000e+00> : vector<2x128xf32>
    %4 = tpu.matmul %1, %2, %cst {dimension_numbers = #tpu.dot_dimension_numbers<[1], [0], [0], [1], [0, 0, 1, 1], [], []>} : vector<2x16xbf16>, vector<16x128xbf16>, vector<2x128xf32> -> vector<2x128xf32>
    %5 = vector.broadcast %3 : vector<1x128xf32> to vector<2x128xf32>
    %6 = arith.addf %4, %5 : vector<2x128xf32>
    %7 = arith.truncf %6 : vector<2x128xf32> to vector<2x128xbf16>
    %cst_5 = arith.constant 0.000000e+00 : bf16
    %8 = vector.broadcast %cst_5 : bf16 to vector<2x128xbf16>
    %9 = arith.maximumf %7, %8 : vector<2x128xbf16>
    %c0_6 = arith.constant 0 : index
    %c0_7 = arith.constant 0 : index
    %10 = vector.load %arg4[%c0_6, %c0_7] : memref<128x8xbf16, #tpu.memory_space<vmem>>, vector<128x8xbf16>
    %c0_8 = arith.constant 0 : index
    %c0_9 = arith.constant 0 : index
    %11 = vector.load %arg5[%c0_8, %c0_9] : memref<1x8xf32, #tpu.memory_space<vmem>>, vector<1x8xf32>
    %cst_10 = arith.constant dense<0.000000e+00> : vector<2x8xf32>
    %12 = tpu.matmul %9, %10, %cst_10 {dimension_numbers = #tpu.dot_dimension_numbers<[1], [0], [0], [1], [0, 0, 1, 1], [], []>} : vector<2x128xbf16>, vector<128x8xbf16>, vector<2x8xf32> -> vector<2x8xf32>
    %13 = vector.broadcast %11 : vector<1x8xf32> to vector<2x8xf32>
    %14 = arith.addf %12, %13 : vector<2x8xf32>
    %c0_11 = arith.constant 0 : index
    %c0_12 = arith.constant 0 : index
    %15 = vector.load %arg6[%c0_11, %c0_12] : memref<2x8xf32, #tpu.memory_space<vmem>>, vector<2x8xf32>
    tpu.vector_store %arg6[%c0_11, %c0_12], %14 {strides = array<i32>} : memref<2x8xf32, #tpu.memory_space<vmem>>, vector<2x8xf32>,
    return
  }
  func.func @transform_0(%arg0: i32) -> (i32, i32) {
    %c0_i32 = arith.constant 0 : i32
    %c0_i32_0 = arith.constant 0 : i32
    return %arg0, %c0_i32 : i32, i32
  }
  func.func @transform_1(%arg0: i32) -> (i32, i32) {
    %c0_i32 = arith.constant 0 : i32
    %c0_i32_0 = arith.constant 0 : i32
    %c0_i32_1 = arith.constant 0 : i32
    return %c0_i32, %c0_i32_0 : i32, i32
  }
  func.func @transform_2(%arg0: i32) -> (i32, i32) {
    %c0_i32 = arith.constant 0 : i32
    %c0_i32_0 = arith.constant 0 : i32
    %c0_i32_1 = arith.constant 0 : i32
    return %c0_i32, %c0_i32_0 : i32, i32
  }
  func.func @transform_3(%arg0: i32) -> (i32, i32) {
    %c0_i32 = arith.constant 0 : i32
    %c0_i32_0 = arith.constant 0 : i32
    %c0_i32_1 = arith.constant 0 : i32
    return %c0_i32, %c0_i32_0 : i32, i32
  }
  func.func @transform_4(%arg0: i32) -> (i32, i32) {
    %c0_i32 = arith.constant 0 : i32
    %c0_i32_0 = arith.constant 0 : i32
    %c0_i32_1 = arith.constant 0 : i32
    return %c0_i32, %c0_i32_0 : i32, i32
  }
  func.func @transform_5(%arg0: i32) -> (i32, i32) {
    %c0_i32 = arith.constant 0 : i32
    %c0_i32_0 = arith.constant 0 : i32
    return %arg0, %c0_i32 : i32, i32
  }
}

</mosaic_0001>

<bundles_post_ra>
// kernel: _mlp_forward.1
= control target key start
LH: loop header
LB: loop body
LE: loop exit
PB: predicated region body
PF: predicated region fallthrough
CT: control target
= control target key end

     0   :  { %v298_v1 = vmov 0.0   ;;  %vm299_vm0 = vmmov 0   ;;  %vm39_vm1 = vcmask 130048   ;;  %s380_s0 = inlined_call_operand.vmem [shape: f32[2,16], index: 0, kind: input, shape index: {}]   ;;  %s381_s1 = inlined_call_operand.vmem [shape: bf16[16,128], index: 1, kind: input, shape index: {}]   ;;  %s382_s2 = inlined_call_operand.vmem [shape: f32[1,128], index: 2, kind: input, shape index: {}]   ;;  %s383_s3 = inlined_call_operand.vmem [shape: bf16[128,8], index: 3, kind: input, shape index: {}]   ;;  %s384_s4 = inlined_call_operand.vmem [shape: f32[1,8], index: 4, kind: input, shape index: {}]   ;;  %s385_s5 = inlined_call_operand.hbm [shape: f32[2,8], index: 5, kind: output, shape index: {}]  }
   0x1   :  { %v265_v0 = vld [vmem:[%s381_s1] sm:$0xff]   ;;  %235 = vmatprep.subr.bf16.mxu0 %v298_v1  ;;  %241 = vmatprep.subr.bf16.mxu1 %v298_v1  ;;  %v267_v5 = vld [vmem:[%s383_s3 + $0x8] sm:$0xff]   ;;  %v268_v6 = vld [vmem:[%s383_s3 + $0x10] sm:$0xff]  }
   0x2   :  { %v22_v2 = vld [vmem:[%s380_s0] sm:$0x3]  ;;  %236 = vmatpush3.bf16.msra.mxu0 %v265_v0  ;;  %237 = vmatprep.mubr.msk.bf16.mxu0 %vm299_vm0, %v298_v1 }
   0x3   :  { %v23_v3 = vpack.c.bf16 %v22_v2, %v22_v2  ;;  %v266_v4 = vld [vmem:[%s383_s3] sm:$0xff]   ;;  %257 = vmatprep.mubr.msk.bf16.mxu1 %vm299_vm0, %v298_v1 }
   0x4   :  { %242 = vmatpush3.bf16.msra.mxu1 %v266_v4 }
   0x5   :  { %238 = vmatmul.mubr.msk.bf16.vlgmr.msra.gmra.mrb[0].mxu0 %vm39_vm1, %v23_v3  ;;  %243 = vmatprep.subr.bf16.mxu1 %v298_v1 }
   0x8   :  { %244 = vmatpush3.bf16.msra.mxu1 %v267_v5 }
   0x9   :  { %245 = vmatprep.subr.bf16.mxu1 %v298_v1 }
   0xa   :  { %10 = vsyncpa [#allocation3], 0  ;;  %v269_v7 = vld [vmem:[%s383_s3 + $0x18] sm:$0xff]   ;;  %v270_v8 = vld [vmem:[%s383_s3 + $0x20] sm:$0xff]   ;;  %v300_v19 = vmov 0   ;;  %s301_s15 = smov [#allocation2]  }
   0xb   :  { %v271_v9 = vld [vmem:[%s383_s3 + $0x28] sm:$0xff]   ;;  %v272_v10 = vld [vmem:[%s383_s3 + $0x30] sm:$0xff]   ;;  %v273_v11 = vld [vmem:[%s383_s3 + $0x38] sm:$0xff]   ;;  %s204_s3 = sshll.u32 %s301_s15, 4  ;;  %vm196_vm2 = vcmask 58368   ;;  %s205_s3 = int_to_ptr.vmem [resolvable:$true] %s204_s3 }
   0xc   :  { %246 = vmatpush3.bf16.msra.mxu1 %v268_v6  ;;  %v212_v12 = vld [vmem:[%s382_s2] ss:$0 sm:$0xff]  ;;  %s274_s2 = scalar_lea.vmem %s205_s3, 32  ;;  %p279_p1 = scmp.lt.s32.totalorder %s205_s3, %s205_s3 }
   0xd   :  { %247 = vmatprep.subr.bf16.mxu1 %v298_v1  ;;  %v215_v21 = vld [vmem:[%s384_s4] ss:$0 sm:$0xff]  ;;  %p275_p0 = scmp.ne.s32.totalorder %s205_s3, %s274_s2  ;;  %p280_p2 = scmp.lt.s32.totalorder %s274_s2, %s274_s2 }
   0xf   :  { %p281_p3 = por %p280_p2, %p279_p1 }
  0x10   :  { %248 = vmatpush3.bf16.msra.mxu1 %v269_v7 }
  0x11   :  { %249 = vmatprep.subr.bf16.mxu1 %v298_v1  ;;  %p282_p4 = pnand %p281_p3, %p275_p0 }
  0x14   :  { %250 = vmatpush3.bf16.msra.mxu1 %v270_v8 }
  0x15   :  { %251 = vmatprep.subr.bf16.mxu1 %v298_v1 }
  0x18   :  { %252 = vmatpush3.bf16.msra.mxu1 %v271_v9 }
  0x19   :  { %253 = vmatprep.subr.bf16.mxu1 %v298_v1 }
  0x1c   :  { %254 = vmatpush3.bf16.msra.mxu1 %v272_v10 }
  0x1d   :  { %255 = vmatprep.subr.bf16.mxu1 %v298_v1 }
  0x20   :  { %256 = vmatpush3.bf16.msra.mxu1 %v273_v11 }
  0xd8   :  { %v77_v13 = vpop.f32.mrb[0].mxu0 }
  0xd9   :  { %v78_v14 = vadd.f32 %v212_v12, %v77_v13  ;;  %v239_v15 = vpop.f32.mrb[1].mxu0 }
  0xda   :  { %v80_v16 = vpop.f32.mrb[2].mxu0 }
  0xdb   :  { %v83_v17 = vpack.c.bf16 %v78_v14, %v78_v14  ;;  %v240_v18 = vpop.f32.mrb[3].mxu0 }
  0xdd   :  { %v84_v20 = vmax.bf16 %v300_v19, %v83_v17 }
  0xdf   :  { %258 = vmatmul.mubr.bf16.vlgmr.msra.gmra.mrb[0].mxu1 %v84_v20 }
 0x1b2   :  { %v190_v22 = vpop.f32.mrb[0].mxu1 }
 0x1b3   :  { %v191_v23 = vadd.f32 %v215_v21, %v190_v22  ;;  %v259_v24 = vpop.f32.mrb[1].mxu1 }
 0x1b4   :  { %v193_v25 = vpop.f32.mrb[2].mxu1 }
 0x1b5   :  { %v260_v26 = vpop.f32.mrb[3].mxu1  ;;  %197 = vst.msk [vmem:[#allocation2] sm:$0x3] %vm196_vm2, %v191_v23 }
 0x1b6   :  { %285 = shalt.err (!%p282_p4)
}
 0x1b7   :  { %s286_s4 = scalar_lea.hbm %s385_s5, 32 }
 0x1b8   :  { %p287_p5 = scmp.ne.s32.totalorder %s385_s5, %s286_s4  ;;  %p290_p6 = scmp.lt.u32.totalorder %s286_s4, %s385_s5 }
 0x1ba   :  { %p292_p7 = pnand %p290_p6, %p287_p5 }
 0x1bc   :  { %295 = shalt.err (!%p292_p7)
}
 0x1bd   :  { %207 = dma.vmem_to_hbm [thread:$0]  %s205_s3, 32, %s385_s5, [#allocation3]  }
 0x1be   :  { %296 = dma.done.wait [#allocation3], 32  }
 0x1bf   :  { %297 = vsyncadd [#allocation3], 4294967264 }
 0x1c0   :  { %211 = vsyncpa [#allocation3], 1 }

</bundles_post_ra>
